<compile_context>
chip_gen: v7x
topology: tpu7x:2x2x1
jax: 0.10.0
libtpu: 0.0.40
codegen_flags: <defaults>
</compile_context>

<pallas_src>
import functools
import math

import jax
import jax.numpy as jnp
from jax.experimental import pallas as pl
from jax.experimental.pallas import tpu as pltpu

_MiB = 1024 * 1024
_LANE = 128


def _rmsnorm_kernel(x_ref, w_ref, o_ref, *, eps: float, inv_dim: float,
                    exact_input_dtype_round: bool):
    # torch: xf = x.float(); var = mean(xf^2, -1, keepdim)
    #        xn = xf * rsqrt(var + eps); out = weight * xn.to(input_dtype)
    x = x_ref[...]                                              # (row_tile, dim)
    xf = x.astype(jnp.float32)
    var = jnp.sum(xf * xf, axis=-1, keepdims=True) * inv_dim    # XLU reduce + VPU mul
    xn = xf * jax.lax.rsqrt(var + eps)
    if exact_input_dtype_round:
        xn = xn.astype(x.dtype)                                 # torch's .to(input_dtype)
    o_ref[...] = (w_ref[...] * xn).astype(o_ref.dtype)


def _round_up(x: int, m: int) -> int:
    return ((x + m - 1) // m) * m


def _sublane_packing(dtype) -> int:
    # minimum sublane multiple: 8 for 4-byte, 16 for 2-byte, 32 for 1-byte dtypes
    return max(8, 32 // jnp.dtype(dtype).itemsize)


def _vmem_budgets() -> tuple[int, int]:
    """(vmem_limit_bytes, per-call block budget) sized to the current chip."""
    cap = None
    try:
        cap = getattr(pltpu.get_tpu_info(), "vmem_capacity_bytes", None)
    except Exception:
        cap = None
    if not cap:
        cap = 64 * _MiB                      # conservative fallback (v7x per-TC)
    cap = int(cap)
    if cap <= 64 * _MiB:
        # v7x-class: never claim the full physical VMEM; leave ~8 MiB headroom
        # for compiler scratch / semaphores.
        vmem_limit = max(16 * _MiB, cap - 8 * _MiB)          # ≈56 MiB on v7x
        block_budget = cap // 3                              # ≈21 MiB on v7x
    else:
        # 128 MiB parts (v5e/v6e): use more of VMEM for bigger DMA blocks.
        vmem_limit = min(cap - 24 * _MiB, 104 * _MiB)
        block_budget = 44 * _MiB
    return int(vmem_limit), int(block_budget)


def _choose_row_tile(rows: int, dim: int, in_dtype, out_dtype,
                     block_budget: int) -> int:
    """Largest row tile whose double-buffered I/O + f32 working set fits."""
    packing = max(_sublane_packing(in_dtype), _sublane_packing(out_dtype))
    in_b = jnp.dtype(in_dtype).itemsize
    out_b = jnp.dtype(out_dtype).itemsize
    # 2x (input block + output block) for double-buffering, plus ~4 B/elem of
    # in-kernel f32 intermediates (xf / xn).
    bytes_per_row = dim * (2 * (in_b + out_b) + 4)
    max_rows_by_vmem = max(packing, block_budget // bytes_per_row)
    rows_rounded_up = _round_up(rows, packing)
    # Keep >= ~8 grid steps when rows allow: DMA/compute overlap needs >1 step
    # and v7x's "parallel" axis needs >= 2 to use both TensorCores.
    min_steps_tile = max(packing, _round_up(pl.cdiv(rows, 8), packing))
    tile = min(2048, max_rows_by_vmem, rows_rounded_up, min_steps_tile)
    tile = max(packing, (tile // packing) * packing)
    return int(tile)


def rmsnorm(x: jax.Array, weight: jax.Array, eps: float = 1e-6, *,
            row_tile: int | None = None,
            exact_input_dtype_round: bool = True,
            output_in_input_dtype: bool = False) -> jax.Array:
    """RMSNorm over the last axis of x; weight has shape (dim,).

    Defaults reproduce the torch module exactly (including the cast of the
    normalized activations back to the input dtype before the weight multiply
    and the torch promotion of the result dtype).
    """
    orig_shape = x.shape
    dim = orig_shape[-1]
    assert weight.shape == (dim,)
    rows = math.prod(orig_shape[:-1])

    x2d = x.reshape(rows, dim)
    w2d = weight.reshape(1, dim)

    # Lane-dense output: pad dim up to a multiple of 128 so stores are
    # unmasked.  Padded columns are zero -> contribute 0 to the per-row sum
    # (inv_dim uses the real dim), and are sliced off afterwards.
    dim_pad = _round_up(dim, _LANE)
    if dim_pad != dim:
        x2d = jnp.pad(x2d, ((0, 0), (0, dim_pad - dim)))
        w2d = jnp.pad(w2d, ((0, 0), (0, dim_pad - dim)))

    out_dtype = (x.dtype if output_in_input_dtype
                 else jnp.result_type(weight.dtype, x.dtype))  # torch promotion

    vmem_limit, block_budget = _vmem_budgets()
    if row_tile is None:
        row_tile = _choose_row_tile(rows, dim_pad, x.dtype, out_dtype,
                                    block_budget)

    kernel = functools.partial(
        _rmsnorm_kernel, eps=eps, inv_dim=1.0 / dim,
        exact_input_dtype_round=exact_input_dtype_round)

    out = pl.pallas_call(
        kernel,
        out_shape=jax.ShapeDtypeStruct((rows, dim_pad), out_dtype),
        grid_spec=pltpu.PrefetchScalarGridSpec(
            num_scalar_prefetch=0,
            grid=(pl.cdiv(rows, row_tile),),       # tail block handled by masked stores
            in_specs=[
                pl.BlockSpec((row_tile, dim_pad), lambda i: (i, 0)),
                pl.BlockSpec((1, dim_pad), lambda i: (0, 0)),   # grid-invariant weight
            ],
            out_specs=pl.BlockSpec((row_tile, dim_pad), lambda i: (i, 0)),
        ),
        compiler_params=pltpu.CompilerParams(
            dimension_semantics=("parallel",),     # shards rows across v7x's 2 TCs
            vmem_limit_bytes=vmem_limit,
        ),
    )(x2d, w2d)

    if dim_pad != dim:
        out = out[:, :dim]
    return out.reshape(orig_shape)


def rmsnorm_ref(x, weight, eps=1e-6):
    xf = x.astype(jnp.float32)
    var = jnp.mean(xf * xf, axis=-1, keepdims=True)
    xn = xf * jax.lax.rsqrt(var + eps)
    return weight * xn.astype(x.dtype)


if __name__ == "__main__":
    key = jax.random.PRNGKey(0)

    # --- f32 case (matches nn.Module default param dtype); dim=32 exercises
    #     the lane-padding path. ---
    batch, seq, hidden = 2, 8, 32
    x = jax.random.normal(key, (batch, seq, hidden), dtype=jnp.float32)
    weight = jnp.ones((hidden,), dtype=jnp.float32) \
        + 0.01 * jnp.arange(hidden, dtype=jnp.float32)

    out = rmsnorm(x, weight, eps=1e-6)
    jax.block_until_ready(out)
    ref = rmsnorm_ref(x, weight, eps=1e-6)
    assert out.shape == x.shape
    assert out.dtype == ref.dtype
    assert jnp.allclose(out, ref, atol=1e-5, rtol=1e-5)

    # --- bf16 activations + uneven row count (masked tail block) ---
    k2 = jax.random.PRNGKey(0)
    xb = jax.random.normal(k2, (3, 5, 128), dtype=jnp.bfloat16)
    wb = jnp.ones((128,), dtype=jnp.float32) \
        + 0.01 * jnp.arange(128, dtype=jnp.float32)
    outb = rmsnorm(xb, wb, eps=1e-6)
    jax.block_until_ready(outb)
    refb = rmsnorm_ref(xb, wb, eps=1e-6)
    assert outb.shape == xb.shape
    assert outb.dtype == refb.dtype
    assert jnp.allclose(outb.astype(jnp.float32), refb.astype(jnp.float32),
                        atol=2e-2, rtol=2e-2)

    # --- fast-path flags (semantics relaxation, gated off by default) ---
    outf = rmsnorm(xb, wb, eps=1e-6, exact_input_dtype_round=False,
                   output_in_input_dtype=True)
    jax.block_until_ready(outf)
    assert outf.dtype == xb.dtype
    assert jnp.allclose(outf.astype(jnp.float32), refb.astype(jnp.float32),
                        atol=3e-2, rtol=3e-2)

    print("KERNEL_OK")
</pallas_src>

<mosaic_0001>
module attributes {stable_mosaic.version = 11 : i64} {
  func.func @_rmsnorm_kernel(%arg0: i32, %arg1: memref<8x128xf32, #tpu.memory_space<vmem>>, %arg2: memref<1x128xf32, #tpu.memory_space<vmem>>, %arg3: memref<8x128xf32, #tpu.memory_space<vmem>>) attributes {dimension_semantics = [#tpu.dimension_semantics<parallel>], iteration_bounds = array<i64: 2>, scalar_prefetch = 0 : i64, scratch_operands = 0 : i64, tpu.core_type = #tpu.core_type<tc>, window_params = [{transform_indices = @transform_0, window_bounds = array<i64: 8, 128>}, {pipeline_mode = #tpu.pipeline_mode<synchronous>, transform_indices = @transform_1, window_bounds = array<i64: 1, 128>}, {transform_indices = @transform_2, window_bounds = array<i64: 8, 128>}]} {
    %c0 = arith.constant 0 : index
    %c0_0 = arith.constant 0 : index
    %0 = vector.load %arg1[%c0, %c0_0] : memref<8x128xf32, #tpu.memory_space<vmem>>, vector<8x128xf32>
    %1 = arith.mulf %0, %0 : vector<8x128xf32>
    %cst = arith.constant dense<0.000000e+00> : vector<8xf32>
    %2 = vector.multi_reduction <add>, %1, %cst [1] : vector<8x128xf32> to vector<8xf32>
    %3 = vector.shape_cast %2 : vector<8xf32> to vector<8x1xf32>
    %cst_1 = arith.constant 3.125000e-02 : f32
    %4 = vector.broadcast %cst_1 : f32 to vector<8x1xf32>
    %5 = arith.mulf %3, %4 : vector<8x1xf32>
    %cst_2 = arith.constant 9.99999997E-7 : f32
    %6 = vector.broadcast %cst_2 : f32 to vector<8x1xf32>
    %7 = arith.addf %5, %6 : vector<8x1xf32>
    %8 = math.rsqrt %7 : vector<8x1xf32>
    %9 = vector.broadcast %8 : vector<8x1xf32> to vector<8x128xf32>
    %10 = arith.mulf %0, %9 : vector<8x128xf32>
    %c0_3 = arith.constant 0 : index
    %c0_4 = arith.constant 0 : index
    %11 = vector.load %arg2[%c0_3, %c0_4] : memref<1x128xf32, #tpu.memory_space<vmem>>, vector<1x128xf32>
    %12 = vector.broadcast %11 : vector<1x128xf32> to vector<8x128xf32>
    %13 = arith.mulf %12, %10 : vector<8x128xf32>
    %c0_5 = arith.constant 0 : index
    %c0_6 = arith.constant 0 : index
    %14 = vector.load %arg3[%c0_5, %c0_6] : memref<8x128xf32, #tpu.memory_space<vmem>>, vector<8x128xf32>
    tpu.vector_store %arg3[%c0_5, %c0_6], %13 {strides = array<i32>} : memref<8x128xf32, #tpu.memory_space<vmem>>, vector<8x128xf32>,
    return
  }
  func.func @transform_0(%arg0: i32) -> (i32, i32) {
    %c0_i32 = arith.constant 0 : i32
    %c0_i32_0 = arith.constant 0 : i32
    return %arg0, %c0_i32 : i32, i32
  }
  func.func @transform_1(%arg0: i32) -> (i32, i32) {
    %c0_i32 = arith.constant 0 : i32
    %c0_i32_0 = arith.constant 0 : i32
    %c0_i32_1 = arith.constant 0 : i32
    return %c0_i32, %c0_i32_0 : i32, i32
  }
  func.func @transform_2(%arg0: i32) -> (i32, i32) {
    %c0_i32 = arith.constant 0 : i32
    %c0_i32_0 = arith.constant 0 : i32
    return %arg0, %c0_i32 : i32, i32
  }
}

</mosaic_0001>

<bundles_post_ra>
// kernel: tpu_custom_call.1
= control target key start
LH: loop header
LB: loop body
LE: loop exit
PB: predicated region body
PF: predicated region fallthrough
CT: control target
= control target key end

     0   :  { %7 = vsyncpa [#allocation3], 0  ;;  %s600_s0 = inlined_call_operand.hbm [shape: f32[16,128], index: 0, kind: input, shape index: {}]   ;;  %s601_s1 = inlined_call_operand.vmem [shape: f32[1,128], index: 1, kind: input, shape index: {}]   ;;  %s602_s2 = inlined_call_operand.hbm [shape: f32[16,128], index: 2, kind: output, shape index: {}]  }
   0x1   :  { %9 = vsyncpa [#allocation3 + $0x1], 0 }
   0x2   :  { %10 = vsyncpa [#allocation4], 0 }
   0x3   :  { %12 = vsyncpa [#allocation4 + $0x1], 0  ;;  %s436_s9 = smov 0   ;;  %s438_s10 = smov 0  }
   0x4   :  { %s440_s11 = smov 0   ;;  %s442_s12 = smov 0  }
   0x5 LB: > { %s457_s13 = sadd.s32 4294967295, %s417_s12   ;;  %s260_s14 = sadd.s32 4294967294, %s417_s12   ;;  %s417_s12 = sphi %s442_s12, %s617_s12   ;;  %s413_s11 = sphi %s440_s11, %s616_s11   ;;  %s409_s10 = sphi %s438_s10, %s615_s10   ;;  %s405_s9 = sphi %s436_s9, %s614_s9  }
   0x6   : > { %s461_s15 = sadd.s32 1, %s417_s12   ;;  %s25_s16 = sadd.s32 1, %s413_s11 }
   0x7   : > { %s22_s17 = ssub.s32 %s417_s12, %s461_s15  ;;  %p32_p0 = scmp.ne.s32.totalorder %s413_s11, %s409_s10 }
   0x8   : > { %p23_p1 = scmp.eq.s32.totalorder %s22_s17, 0  ;;  %p33_p2 = scmp.eq.s32.totalorder %s417_s12, 0 }
   0x9   : > { %p38_p3 = scmp.ne.s32.totalorder %s409_s10, %s405_s9  ;;  %p39_p4 = scmp.eq.s32.totalorder %s457_s13, 0 }
   0xa   : > { %s473_s18 = scalar_select %p23_p1, %s413_s11, %s25_s16  }
   0xb   : > { %p475_p5 = por %p33_p2, %p32_p0  ;;  %p479_p6 = por %p39_p4, %p38_p3 }
   0xc   : > { %p83_p7 = scmp.eq.s32.totalorder %s457_s13, 1  ;;  %p89_p8 = scmp.eq.s32.totalorder %s260_s14, 1 }
   0xd   : > { %p285_p10 = scmp.lt.s32.totalorder %s417_s12, 2  ;;  %s112_s23 = sand.u32 1, %s413_s11  }
   0xe   : > { %p486_p11 = por %p83_p7, %p32_p0  ;;  %p490_p12 = por %p89_p8, %p38_p3 }
   0xf   : > { %s264_s24 = sshll.u32 %s417_s12, 7  ;;  %s263_s25 = sshll.u32 %s112_s23, 3 }
  0x10   : > { %s606_s21 = scalar_select %p486_p11, 1, 0 }
  0x11   : > { %s607_s22 = scalar_select %p490_p12, 1, 0 }
  0x12   : > { %s499_s28 = scalar_lea.hbm %s600_s0, %s264_s24  ;;  %s116_s29 = scalar_lea.vmem [#allocation2], %s263_s25 }
  0x13   : > { %s123_s30 = sshll.u32 %s116_s29, 4  ;;  %p503_p13 = pnand %p285_p10, %p475_p5  ;;  %s507_s30 = int_to_ptr.vmem [resolvable:$true] %s123_s30 }
  0x14   : > { %s113_s4 = scalar_lea.sflag [#allocation3], %s112_s23  ;;  %s321_s5 = scalar_lea.hbm %s499_s28, 128 }
  0x15   : > { %p322_p2 = scmp.ne.s32.totalorder %s499_s28, %s321_s5  ;;  %p323_p3 = pneg %p503_p13 }
  0x16   : > { %s326_s8 = scalar_lea.hbm %s600_s0, 256  ;;  %p327_p5 = scmp.lt.u32.totalorder %s499_s28, %s600_s0 }
  0x17   : > { %p324_p4 = pnand %p323_p3, %p322_p2  ;;  %p328_p8 = scmp.lt.u32.totalorder %s326_s8, %s321_s5 }
  0x18   : > { %p330_p9 = scmp.lt.u32.totalorder %s321_s5, %s499_s28 }
  0x19   : > { %p325_p7 = pneg %p324_p4  ;;  %p329_p10 = por %p328_p8, %p327_p5 }
  0x1b   : > { %p331_p0 = por %p330_p9, %p329_p10 }
  0x1d   : > { %p332_p1 = pnand %p331_p0, %p325_p7 }
  0x1f   : > { %335 = shalt.err (!%p332_p1)
}
  0x20   : > { %s336_s17 = scalar_lea.vmem %s507_s30, 128  ;;  %s419_s19 = smov [#allocation2]  }
  0x21   : > { %p337_p2 = scmp.ne.s32.totalorder %s507_s30, %s336_s17  ;;  %s341_s23 = sshll.u32 %s419_s19, 4  ;;  %s342_s23 = int_to_ptr.vmem [resolvable:$false] %s341_s23 }
  0x22   : > { %s343_s24 = scalar_lea.vmem %s342_s23, 256  ;;  %p344_p11 = scmp.lt.s32.totalorder %s507_s30, %s342_s23 }
  0x23   : > { %p339_p4 = pnand %p337_p2, %p323_p3  ;;  %p345_p5 = scmp.lt.s32.totalorder %s343_s24, %s336_s17 }
  0x25   : > { %p340_p12 = pneg %p339_p4  ;;  %p346_p8 = por %p345_p5, %p344_p11 }
  0x27   : > { %p347_p9 = pnand %p346_p8, %p340_p12 }
  0x29   : > { %350 = shalt.err (!%p347_p9)
}
  0x2a   : > { %280 = dma.hbm_to_vmem [thread:$0]  (!%p503_p13), %s499_s28, 128, %s507_s30, %s113_s4  }
  0x2b   : > { %p609_p0 = scmp.lt.s32.totalorder %s417_s12, 3  ;;  %p610_p1 = scmp.ge.s32.totalorder %s417_s12, 1 }
  0x2d   : > { %p129_p3 = pnand %p610_p1, %p609_p0 }
  0x2e   : > { %s541_s25 = sand.u32 (!%p129_p3), 1, %s409_s10  }
  0x2f   : > { %132 = sbr.rel (%p129_p3) target bundleno = 233 (0xe9), region = 28  ;;  %s266_s26 = sshll.u32 (!%p129_p3), %s541_s25, 3 }
  0x30   : > { %s135_s27 = scalar_lea.sflag (!%p129_p3), [#allocation3], %s541_s25  ;;  %s138_s29 = scalar_lea.vmem (!%p129_p3), [#allocation2], %s266_s26 }
  0x36   : > { %396 = dma.done.wait (%p479_p6), %s135_s27, 128  }
  0x37   : > { %398 = vsyncadd (%p479_p6), %s135_s27, 4294967168  ;;  %v159_v0 = vld [vmem:[%s138_s29] sm:$0xff]  ;;  %s270_s3 = sshll.u32 %s457_s13, 7  ;;  %s158_s4 = scalar_lea.vmem [#allocation5], %s266_s26 }
  0x38   : > { %v160_v1 = vmul.f32 %v159_v0, %v159_v0  ;;  %v268_v6 = vld [vmem:[%s601_s1] ss:$0 sm:$0xff]  ;;  %s190_s5 = sshll.u32 %s158_s4, 4  ;;  %s556_s7 = scalar_lea.hbm %s602_s2, %s270_s3  ;;  %s558_s5 = int_to_ptr.vmem [resolvable:$true] %s190_s5 }
  0x39   : > { %s177_s8 = scalar_lea.sflag [#allocation4], %s541_s25  ;;  %s351_s14 = scalar_lea.vmem %s558_s5, 128 }
  0x3a   : > { %161 = vadd.xlane.f32.xlu0 %v160_v1  ;;  %p352_p6 = scmp.ne.s32.totalorder %s558_s5, %s351_s14  ;;  %p611_p11 = scmp.ne.s32.totalorder %s606_s21, 0 }
  0x3b   : > { %s420_s13 = smov [#allocation5]  }
  0x3c   : > { %p353_p12 = pnand %p352_p6, %p611_p11  ;;  %s355_s16 = sshll.u32 %s420_s13, 4  ;;  %s356_s16 = int_to_ptr.vmem [resolvable:$false] %s355_s16 }
  0x3d   : > { %s357_s17 = scalar_lea.vmem %s356_s16, 256  ;;  %p358_p7 = scmp.lt.s32.totalorder %s558_s5, %s356_s16 }
  0x3e   : > { %p354_p13 = pneg %p353_p12  ;;  %p359_p10 = scmp.lt.s32.totalorder %s357_s17, %s351_s14 }
  0x40   : > { %p360_p2 = por %p359_p10, %p358_p7 }
  0x42   : > { %p361_p4 = pnand %p360_p2, %p354_p13 }
  0xc7   : > { %v162_v2 = vpop.xlane.xlu0 %161 }
  0xc8   : > { %v163_v3 = vmul.f32 0.03125, %v162_v2 }
  0xca   : > { %v164_v4 = vadd.f32 1e-06, %v163_v3 }
  0xcc   : > { %319 = vrsqrt.f32 %v164_v4 }
  0xd6   : > { %v320_v5 = vpop.eup %319 }
  0xd7   : > { %v166_v7 = vmul.f32 %v320_v5, %v159_v0 }
  0xd9   : > { %v174_v8 = vmul.f32 %v268_v6, %v166_v7 }
  0xdb   : > { %175 = vst [vmem:[%s158_s4] sm:$0xff] %v174_v8 }
  0xdc   : > { %364 = shalt.err (!%p361_p4)
}
  0xdd   : > { %s365_s19 = scalar_lea.hbm %s556_s7, 128  ;;  %s369_s25 = scalar_lea.hbm %s602_s2, 256 }
  0xde   : > { %p366_p5 = scmp.ne.s32.totalorder %s556_s7, %s365_s19  ;;  %p370_p0 = scmp.lt.u32.totalorder %s556_s7, %s602_s2 }
  0xdf   : > { %p371_p1 = scmp.lt.u32.totalorder %s369_s25, %s365_s19  ;;  %p373_p6 = scmp.lt.u32.totalorder %s365_s19, %s556_s7 }
  0xe0   : > { %p367_p8 = pnand %p366_p5, %p611_p11 }
  0xe1   : > { %p372_p3 = por %p371_p1, %p370_p0 }
  0xe2   : > { %p368_p9 = pneg %p367_p8 }
  0xe3   : > { %p374_p12 = por %p373_p6, %p372_p3 }
  0xe5   : > { %p375_p13 = pnand %p374_p12, %p368_p9 }
  0xe7   : > { %378 = shalt.err (!%p375_p13)
}
  0xe8   : > { %275 = dma.vmem_to_hbm [thread:$0]  (%p611_p11), %s558_s5, 128, %s556_s7, %s177_s8  }
  0xe9 PF: > { %s202_s29 = sand.u32 1, %s405_s9   ;;  %p612_p7 = scmp.ne.s32.totalorder %s607_s22, 0 }
  0xea   : > { %p613_p10 = scmp.ge.s32.totalorder %s417_s12, 2  ;;  %s203_s28 = scalar_lea.sflag [#allocation4], %s202_s29 }
  0xec   : > { %p282_p2 = pnand %p613_p10, %p612_p7 }
  0xee   : > { %400 = dma.done.wait (!%p282_p2), %s203_s28, 128  }
  0xef   : > { %402 = vsyncadd (!%p282_p2), %s203_s28, 4294967168  ;;  %p15_p4 = scmp.ge.s32.totalorder %s461_s15, 4   ;;  %s614_s9 = smov %s409_s10 }
  0xf0   : > { %s615_s10 = smov %s413_s11  ;;  %s616_s11 = smov %s473_s18 }
  0xf1   : > { %s617_s12 = smov %s461_s15  ;;  %17 = sbr.rel (!%p15_p4) target bundleno = 5 (0x5), region = 73 }
  0xf8   :  { %208 = vsyncpa [#allocation3], 1 }
  0xf9   :  { %210 = vsyncpa [#allocation3 + $0x1], 1 }
  0xfa   :  { %211 = vsyncpa [#allocation4], 1 }
  0xfb   :  { %213 = vsyncpa [#allocation4 + $0x1], 1 }

</bundles_post_ra>
